<compile_context>
chip_gen: v6e
topology: v6e:2x2x1
jax: 0.10.0
libtpu: 0.0.40
codegen_flags: <defaults>
</compile_context>

<pallas_src>
import functools
import math

import jax
import jax.numpy as jnp
from jax.experimental import pallas as pl
from jax.experimental.pallas import tpu as pltpu


# ----------------------------------------------------------------------------- helpers
def _round_up(a, b):
    return (a + b - 1) // b * b


def _pick_block_rows(total_rows, row_bytes, target_bytes):
    """Largest multiple-of-8 row count with block ~= target_bytes (>= 8 rows)."""
    rows = max(8, (target_bytes // max(row_bytes, 1)) // 8 * 8)
    rows = min(rows, _round_up(total_rows, 8))
    return int(rows)


def _vmem_limit(block_vmem_bytes):
    # input + output blocks, double-buffered, plus constants / headroom.
    need = 4 * block_vmem_bytes + (4 << 20)
    # Raise above the small per-generation scoped defaults (v5e: 16 MiB) but stay
    # <= 48 MiB so the config is also safe on v7x (64 MiB physical VMEM per TC).
    return int(min(48 * 1024 * 1024, max(need, 32 * 1024 * 1024)))


def _group_sum_exact(v, p_bf16, n_parts=3):
    """Per-lane sum of `v` over its lane-group, broadcast back to every lane of the group.

    Implemented as v @ P with P the 0/1 block-diagonal group-membership matrix, run on
    the MXU. Exactness (to f32 level) is preserved by splitting the f32 operand into
    bf16 components (v = c0 + c1 + c2 exactly up to ~2^-26 relative)."""
    acc = None
    r = v
    for i in range(n_parts):
        comp = r.astype(jnp.bfloat16)
        if i + 1 < n_parts:
            r = r - comp.astype(jnp.float32)
        term = jnp.dot(comp, p_bf16, preferred_element_type=jnp.float32)
        acc = term if acc is None else acc + term
    return acc


# ----------------------------------------------------------------------------- kernels
def _ln_packed_kernel(x_ref, w_ref, b_ref, p_ref, o_ref, *, c, eps, subtract_mean):
    """Lane-dense path: each 128-lane row holds 128//c consecutive tokens' channels."""
    x = x_ref[...].astype(jnp.float32)            # (TR, 128)
    p = p_ref[...]                                # (128, 128) bf16 block-diagonal ones
    inv_c = 1.0 / c
    s = _group_sum_exact(x, p)                    # per-lane: sum over own token's channels
    ss = _group_sum_exact(x * x, p)
    mean = s * inv_c
    var = ss * inv_c - mean * mean                # single-pass variance, f32
    inv = jax.lax.rsqrt(var + eps)                # EUP
    w = w_ref[...].astype(jnp.float32)            # (1, 128) = weight tiled G times
    if subtract_mean:
        y = (x - mean) * inv * w + b_ref[...].astype(jnp.float32)
    else:
        y = x * inv * w                           # BiasFree: no mean centering of x
    o_ref[...] = y.astype(o_ref.dtype)


def _ln_rowwise_kernel(x_ref, w_ref, b_ref, o_ref, *, eps, subtract_mean):
    """General path: reduce over the last dim (C lanes) directly."""
    x = x_ref[...].astype(jnp.float32)            # (TM, C)
    inv_c = 1.0 / x.shape[-1]
    mean = jnp.sum(x, axis=-1, keepdims=True) * inv_c
    meansq = jnp.sum(x * x, axis=-1, keepdims=True) * inv_c
    var = meansq - mean * mean                    # single-pass variance, f32
    inv = jax.lax.rsqrt(var + eps)
    w = w_ref[...].astype(jnp.float32)            # (1, C)
    if subtract_mean:
        y = (x - mean) * inv * w + b_ref[...].astype(jnp.float32)
    else:
        y = x * inv * w
    o_ref[...] = y.astype(o_ref.dtype)


# ----------------------------------------------------------------------------- wrapper
def pallas_layernorm(x, weight, bias=None, *, eps=1e-5,
                     target_block_bytes=4 * 1024 * 1024, block_rows=None):
    """LayerNorm over the last dim of x (any leading dims).

    bias=None  -> BiasFree_LayerNorm :  x / sqrt(var + eps) * weight
    bias given -> WithBias_LayerNorm : (x - mean) / sqrt(var + eps) * weight + bias
    """
    orig_shape = x.shape
    C = int(orig_shape[-1])
    M = int(math.prod(orig_shape[:-1])) if len(orig_shape) > 1 else 1
    x2 = x.reshape(M, C)
    itemsize = jnp.dtype(x.dtype).itemsize
    with_bias = bias is not None

    w_flat = weight.reshape(-1)
    b_flat = bias.reshape(-1) if with_bias else jnp.zeros((C,), w_flat.dtype)

    use_packed = (C < 128) and (128 % C == 0)

    if use_packed:
        # ---- lane-dense path: pack G tokens per 128-lane row ----
        G = 128 // C
        rows_needed = -(-M // G)
        TR = block_rows if block_rows is not None else _pick_block_rows(
            rows_needed, 128 * itemsize, target_block_bytes)
        assert TR % 8 == 0, "block_rows must be a multiple of 8"
        rows_pad = _round_up(rows_needed, TR)
        M_pad = rows_pad * G
        if M_pad != M:
            x2 = jnp.pad(x2, ((0, M_pad - M), (0, 0)))
        x_in = x2.reshape(rows_pad, 128)
        w_in = jnp.tile(w_flat, G).reshape(1, 128)
        b_in = jnp.tile(b_flat, G).reshape(1, 128)
        lane = jnp.arange(128)
        p_in = (lane[:, None] // C == lane[None, :] // C).astype(jnp.bfloat16)

        grid = (rows_pad // TR,)
        block_vmem = TR * 128 * itemsize
        kernel = functools.partial(_ln_packed_kernel, c=C, eps=eps,
                                   subtract_mean=with_bias)
        out = pl.pallas_call(
            kernel,
            out_shape=jax.ShapeDtypeStruct((rows_pad, 128), x.dtype),
            grid=grid,
            in_specs=[
                pl.BlockSpec((TR, 128), lambda i: (i, 0)),
                pl.BlockSpec((1, 128), lambda i: (0, 0)),
                pl.BlockSpec((1, 128), lambda i: (0, 0)),
                pl.BlockSpec((128, 128), lambda i: (0, 0)),
            ],
            out_specs=pl.BlockSpec((TR, 128), lambda i: (i, 0)),
            compiler_params=pltpu.CompilerParams(
                dimension_semantics=("parallel",),
                vmem_limit_bytes=_vmem_limit(block_vmem)),
        )(x_in, w_in, b_in, p_in)
        out = out.reshape(M_pad, C)[:M]
    else:
        # ---- general path: big (TM, C) blocks, reduce over the last dim ----
        row_bytes_vmem = _round_up(C, 128) * itemsize   # VMEM lane padding
        TM = block_rows if block_rows is not None else _pick_block_rows(
            M, row_bytes_vmem, target_block_bytes)
        assert TM % 8 == 0, "block_rows must be a multiple of 8"
        M_pad = _round_up(M, TM)
        if M_pad != M:
            x2 = jnp.pad(x2, ((0, M_pad - M), (0, 0)))
        w_in = w_flat.reshape(1, C)
        b_in = b_flat.reshape(1, C)

        grid = (M_pad // TM,)
        block_vmem = TM * row_bytes_vmem
        kernel = functools.partial(_ln_rowwise_kernel, eps=eps,
                                   subtract_mean=with_bias)
        out = pl.pallas_call(
            kernel,
            out_shape=jax.ShapeDtypeStruct((M_pad, C), x.dtype),
            grid=grid,
            in_specs=[
                pl.BlockSpec((TM, C), lambda i: (i, 0)),
                pl.BlockSpec((1, C), lambda i: (0, 0)),
                pl.BlockSpec((1, C), lambda i: (0, 0)),
            ],
            out_specs=pl.BlockSpec((TM, C), lambda i: (i, 0)),
            compiler_params=pltpu.CompilerParams(
                dimension_semantics=("parallel",),
                vmem_limit_bytes=_vmem_limit(block_vmem)),
        )(x2, w_in, b_in)
        out = out[:M]

    return out.reshape(orig_shape)


# ----------------------------------------------------------------------------- reference
def _ref_layernorm(x, weight, bias=None, eps=1e-5):
    x32 = x.astype(jnp.float32)
    mu = jnp.mean(x32, axis=-1, keepdims=True)
    var = jnp.mean((x32 - mu) ** 2, axis=-1, keepdims=True)
    w = weight.astype(jnp.float32)
    if bias is None:                                      # BiasFree: no mean centering
        return x32 / jnp.sqrt(var + eps) * w
    return (x32 - mu) / jnp.sqrt(var + eps) * w + bias.astype(jnp.float32)


# ----------------------------------------------------------------------------- demo
if __name__ == "__main__":
    key = jax.random.PRNGKey(0)
    k1, k2, k3, k4, k5 = jax.random.split(key, 5)

    # Case 1: BiasFree LayerNorm (MamberBlock norm with LayerNorm_type='BiasFree'),
    # dim=32 -> lane-packed fast path; ragged token count + forced multi-block grid.
    B, H, W, C = 2, 15, 15, 32
    x = jax.random.normal(k1, (B, H * W, C), dtype=jnp.float32)   # to_3d layout (b, hw, c)
    w = 1.0 + 0.1 * jax.random.normal(k2, (C,), dtype=jnp.float32)
    out = jax.block_until_ready(pallas_layernorm(x, w, block_rows=32))
    ref = _ref_layernorm(x, w)
    assert out.shape == x.shape and out.dtype == x.dtype
    assert jnp.allclose(out.astype(jnp.float32), ref, atol=1e-5, rtol=1e-5), "case1 mismatch"

    # Case 2: WithBias LayerNorm, dim=48 (128 % 48 != 0) -> general path, padded grid.
    C2 = 48
    x2 = jax.random.normal(k3, (2, 64, C2), dtype=jnp.float32)
    w2 = 1.0 + 0.1 * jax.random.normal(k4, (C2,), dtype=jnp.float32)
    b2 = 0.1 * jax.random.normal(k5, (C2,), dtype=jnp.float32)
    out2 = jax.block_until_ready(pallas_layernorm(x2, w2, b2, block_rows=40))
    ref2 = _ref_layernorm(x2, w2, b2)
    assert jnp.allclose(out2.astype(jnp.float32), ref2, atol=1e-5, rtol=1e-5), "case2 mismatch"

    # Case 3: bf16 I/O (halves HBM traffic for this bandwidth-bound op), default blocks.
    xb = x.astype(jnp.bfloat16)
    outb = jax.block_until_ready(pallas_layernorm(xb, w))
    refb = _ref_layernorm(xb, w)
    assert outb.dtype == jnp.bfloat16
    assert jnp.allclose(outb.astype(jnp.float32), refb, atol=5e-2, rtol=5e-2), "case3 mismatch"

    print("KERNEL_OK")
</pallas_src>

<mosaic_0001>
module attributes {stable_mosaic.version = 11 : i64} {
  func.func @_ln_packed_kernel(%arg0: i32, %arg1: memref<32x128xf32, #tpu.memory_space<vmem>>, %arg2: memref<1x128xf32, #tpu.memory_space<vmem>>, %arg3: memref<1x128xf32, #tpu.memory_space<vmem>>, %arg4: memref<128x128xbf16, #tpu.memory_space<vmem>>, %arg5: memref<32x128xf32, #tpu.memory_space<vmem>>) attributes {dimension_semantics = [#tpu.dimension_semantics<parallel>], iteration_bounds = array<i64: 4>, scalar_prefetch = 0 : i64, scratch_operands = 0 : i64, tpu.core_type = #tpu.core_type<tc>, window_params = [{transform_indices = @transform_0, window_bounds = array<i64: 32, 128>}, {pipeline_mode = #tpu.pipeline_mode<synchronous>, transform_indices = @transform_1, window_bounds = array<i64: 1, 128>}, {pipeline_mode = #tpu.pipeline_mode<synchronous>, transform_indices = @transform_2, window_bounds = array<i64: 1, 128>}, {pipeline_mode = #tpu.pipeline_mode<synchronous>, transform_indices = @transform_3, window_bounds = array<i64: 128, 128>}, {transform_indices = @transform_4, window_bounds = array<i64: 32, 128>}]} {
    %c0 = arith.constant 0 : index
    %c0_0 = arith.constant 0 : index
    %0 = vector.load %arg1[%c0, %c0_0] : memref<32x128xf32, #tpu.memory_space<vmem>>, vector<32x128xf32>
    %c0_1 = arith.constant 0 : index
    %c0_2 = arith.constant 0 : index
    %1 = vector.load %arg4[%c0_1, %c0_2] : memref<128x128xbf16, #tpu.memory_space<vmem>>, vector<128x128xbf16>
    %2 = arith.truncf %0 : vector<32x128xf32> to vector<32x128xbf16>
    %3 = arith.extf %2 : vector<32x128xbf16> to vector<32x128xf32>
    %4 = arith.subf %0, %3 : vector<32x128xf32>
    %cst = arith.constant dense<0.000000e+00> : vector<32x128xf32>
    %5 = tpu.matmul %2, %1, %cst {dimension_numbers = #tpu.dot_dimension_numbers<[1], [0], [0], [1], [0, 0, 1, 1], [], []>} : vector<32x128xbf16>, vector<128x128xbf16>, vector<32x128xf32> -> vector<32x128xf32>
    %6 = arith.truncf %4 : vector<32x128xf32> to vector<32x128xbf16>
    %7 = arith.extf %6 : vector<32x128xbf16> to vector<32x128xf32>
    %8 = arith.subf %4, %7 : vector<32x128xf32>
    %cst_3 = arith.constant dense<0.000000e+00> : vector<32x128xf32>
    %9 = tpu.matmul %6, %1, %cst_3 {dimension_numbers = #tpu.dot_dimension_numbers<[1], [0], [0], [1], [0, 0, 1, 1], [], []>} : vector<32x128xbf16>, vector<128x128xbf16>, vector<32x128xf32> -> vector<32x128xf32>
    %10 = arith.addf %5, %9 : vector<32x128xf32>
    %11 = arith.truncf %8 : vector<32x128xf32> to vector<32x128xbf16>
    %cst_4 = arith.constant dense<0.000000e+00> : vector<32x128xf32>
    %12 = tpu.matmul %11, %1, %cst_4 {dimension_numbers = #tpu.dot_dimension_numbers<[1], [0], [0], [1], [0, 0, 1, 1], [], []>} : vector<32x128xbf16>, vector<128x128xbf16>, vector<32x128xf32> -> vector<32x128xf32>
    %13 = arith.addf %10, %12 : vector<32x128xf32>
    %14 = arith.mulf %0, %0 : vector<32x128xf32>
    %15 = arith.truncf %14 : vector<32x128xf32> to vector<32x128xbf16>
    %16 = arith.extf %15 : vector<32x128xbf16> to vector<32x128xf32>
    %17 = arith.subf %14, %16 : vector<32x128xf32>
    %cst_5 = arith.constant dense<0.000000e+00> : vector<32x128xf32>
    %18 = tpu.matmul %15, %1, %cst_5 {dimension_numbers = #tpu.dot_dimension_numbers<[1], [0], [0], [1], [0, 0, 1, 1], [], []>} : vector<32x128xbf16>, vector<128x128xbf16>, vector<32x128xf32> -> vector<32x128xf32>
    %19 = arith.truncf %17 : vector<32x128xf32> to vector<32x128xbf16>
    %20 = arith.extf %19 : vector<32x128xbf16> to vector<32x128xf32>
    %21 = arith.subf %17, %20 : vector<32x128xf32>
    %cst_6 = arith.constant dense<0.000000e+00> : vector<32x128xf32>
    %22 = tpu.matmul %19, %1, %cst_6 {dimension_numbers = #tpu.dot_dimension_numbers<[1], [0], [0], [1], [0, 0, 1, 1], [], []>} : vector<32x128xbf16>, vector<128x128xbf16>, vector<32x128xf32> -> vector<32x128xf32>
    %23 = arith.addf %18, %22 : vector<32x128xf32>
    %24 = arith.truncf %21 : vector<32x128xf32> to vector<32x128xbf16>
    %cst_7 = arith.constant dense<0.000000e+00> : vector<32x128xf32>
    %25 = tpu.matmul %24, %1, %cst_7 {dimension_numbers = #tpu.dot_dimension_numbers<[1], [0], [0], [1], [0, 0, 1, 1], [], []>} : vector<32x128xbf16>, vector<128x128xbf16>, vector<32x128xf32> -> vector<32x128xf32>
    %26 = arith.addf %23, %25 : vector<32x128xf32>
    %cst_8 = arith.constant 3.125000e-02 : f32
    %27 = vector.broadcast %cst_8 : f32 to vector<32x128xf32>
    %28 = arith.mulf %13, %27 : vector<32x128xf32>
    %cst_9 = arith.constant 3.125000e-02 : f32
    %29 = vector.broadcast %cst_9 : f32 to vector<32x128xf32>
    %30 = arith.mulf %26, %29 : vector<32x128xf32>
    %31 = arith.mulf %28, %28 : vector<32x128xf32>
    %32 = arith.subf %30, %31 : vector<32x128xf32>
    %cst_10 = arith.constant 9.99999974E-6 : f32
    %33 = vector.broadcast %cst_10 : f32 to vector<32x128xf32>
    %34 = arith.addf %32, %33 : vector<32x128xf32>
    %35 = math.rsqrt %34 : vector<32x128xf32>
    %c0_11 = arith.constant 0 : index
    %c0_12 = arith.constant 0 : index
    %36 = vector.load %arg2[%c0_11, %c0_12] : memref<1x128xf32, #tpu.memory_space<vmem>>, vector<1x128xf32>
    %37 = arith.mulf %0, %35 : vector<32x128xf32>
    %38 = vector.broadcast %36 : vector<1x128xf32> to vector<32x128xf32>
    %39 = arith.mulf %37, %38 : vector<32x128xf32>
    %c0_13 = arith.constant 0 : index
    %c0_14 = arith.constant 0 : index
    %40 = vector.load %arg5[%c0_13, %c0_14] : memref<32x128xf32, #tpu.memory_space<vmem>>, vector<32x128xf32>
    tpu.vector_store %arg5[%c0_13, %c0_14], %39 {strides = array<i32>} : memref<32x128xf32, #tpu.memory_space<vmem>>, vector<32x128xf32>,
    return
  }
  func.func @transform_0(%arg0: i32) -> (i32, i32) {
    %c0_i32 = arith.constant 0 : i32
    %c0_i32_0 = arith.constant 0 : i32
    return %arg0, %c0_i32 : i32, i32
  }
  func.func @transform_1(%arg0: i32) -> (i32, i32) {
    %c0_i32 = arith.constant 0 : i32
    %c0_i32_0 = arith.constant 0 : i32
    %c0_i32_1 = arith.constant 0 : i32
    return %c0_i32, %c0_i32_0 : i32, i32
  }
  func.func @transform_2(%arg0: i32) -> (i32, i32) {
    %c0_i32 = arith.constant 0 : i32
    %c0_i32_0 = arith.constant 0 : i32
    %c0_i32_1 = arith.constant 0 : i32
    return %c0_i32, %c0_i32_0 : i32, i32
  }
  func.func @transform_3(%arg0: i32) -> (i32, i32) {
    %c0_i32 = arith.constant 0 : i32
    %c0_i32_0 = arith.constant 0 : i32
    %c0_i32_1 = arith.constant 0 : i32
    return %c0_i32, %c0_i32_0 : i32, i32
  }
  func.func @transform_4(%arg0: i32) -> (i32, i32) {
    %c0_i32 = arith.constant 0 : i32
    %c0_i32_0 = arith.constant 0 : i32
    return %arg0, %c0_i32 : i32, i32
  }
}

</mosaic_0001>

<bundles_post_ra>
// kernel: tpu_custom_call.1
= control target key start
LH: loop header
LB: loop body
LE: loop exit
PB: predicated region body
PF: predicated region fallthrough
CT: control target
= control target key end

     0   :  { %9 = vsyncpa [#allocation3], 0  ;;  %s1574_s0 = inlined_call_operand.hbm [shape: f32[128,128], index: 0, kind: input, shape index: {}]   ;;  %s1575_s1 = inlined_call_operand.vmem [shape: f32[1,128], index: 1, kind: input, shape index: {}]   ;;  %s1576_s2 = inlined_call_operand.vmem [shape: f32[1,128], index: 2, kind: input, shape index: {}]   ;;  %s1577_s3 = inlined_call_operand.hbm [shape: bf16[128,128], index: 3, kind: input, shape index: {}]   ;;  %s1578_s4 = inlined_call_operand.hbm [shape: f32[128,128], index: 4, kind: output, shape index: {}]  }
   0x1   :  { %11 = vsyncpa [#allocation3 + $0x1], 0 }
   0x2   :  { %12 = vsyncpa [#allocation6], 0 }
   0x3   :  { %13 = vsyncpa [#allocation4], 0 }
   0x4   :  { %15 = vsyncpa [#allocation4 + $0x1], 0  ;;  %s1236_s15 = smov 0   ;;  %s1238_s16 = smov 0  }
   0x5   :  { %s1240_s17 = smov 0   ;;  %s1242_s18 = smov 0  }
   0x6 LB: > { %s1257_s2 = sadd.s32 4294967295, %s1200_s18   ;;  %s792_s19 = sadd.s32 4294967294, %s1200_s18   ;;  %s1200_s18 = sphi %s1242_s18, %s1599_s18   ;;  %s1196_s17 = sphi %s1240_s17, %s1598_s17   ;;  %s1192_s16 = sphi %s1238_s16, %s1597_s16   ;;  %s1188_s15 = sphi %s1236_s15, %s1596_s15  }
   0x7   : > { %p41_p0 = scmp.ne.s32.totalorder %s1192_s16, %s1188_s15  ;;  %p1579_p1 = scmp.eq.s32.totalorder %s1257_s2, 0 }
   0x8   : > { %p134_p3 = scmp.eq.s32.totalorder %s792_s19, 3  ;;  %p793_p5 = scmp.ge.s32.totalorder %s1200_s18, 1 }
   0x9   : > { %p1266_p4 = por %p1579_p1, %p41_p0  ;;  %p141_p7 = scmp.lt.s32.totalorder %s1200_s18, 5 }
   0xa   : > { %p1271_p6 = por %p134_p3, %p41_p0  ;;  %s1202_s23 = smov [#allocation5]  }
   0xb   : > { %s1583_s20 = scalar_select %p1266_p4, 1, 0 }
   0xc   : > { %s1584_s21 = scalar_select %p1271_p6, 1, 0 }
   0xd   : > { %p1276_p8 = pnand %p793_p5, %p141_p7  ;;  %s159_s24 = sshll.u32 %s1202_s23, 4  ;;  %s160_s24 = int_to_ptr.vmem [resolvable:$true] %s159_s24 }
   0xe   : > { %s1289_s26 = sadd.s32 1, %s1200_s18   ;;  %s28_s27 = sadd.s32 1, %s1196_s17 }
   0xf   : > { %s1585_s22 = scalar_select %p1276_p8, 1, 0 }
  0x10   : > { %p1007_p9 = pneg %p1276_p8  ;;  %s25_s28 = ssub.s32 %s1200_s18, %s1289_s26 }
  0x11   : > { %s1089_s29 = scalar_lea.vmem %s160_s24, 1024  ;;  %p1097_p3 = scmp.lt.s32.totalorder %s160_s24, %s160_s24 }
  0x12   : > { %p1284_p10 = pnand %p1007_p9, %p1579_p1  ;;  %p1090_p12 = scmp.ne.s32.totalorder %s160_s24, %s1089_s29 }
  0x13   : > { %p1098_p5 = scmp.lt.s32.totalorder %s1089_s29, %s1089_s29 }
  0x14   : > { %p1080_p11 = pneg %p1284_p10 }
  0x15   : > { %p1099_p7 = por %p1098_p5, %p1097_p3 }
  0x16   : > { %p1092_p13 = pnand %p1090_p12, %p1080_p11 }
  0x18   : > { %p1093_p0 = pneg %p1092_p13 }
  0x1a   : > { %p1100_p2 = pnand %p1099_p7, %p1093_p0 }
  0x1c   : > { %1103 = shalt.err (!%p1100_p2)
}
  0x1d   : > { %s1203_s30 = smov 64   ;;  %s1204_s5 = smov 4  }
  0x1e   : > { %1010 = dma.hbm_to_vmem [thread:$0]  (!%p1284_p10), %s1577_s3, 1024, %s160_s24, [#allocation6], %s1203_s30, %s1203_s30, %s1204_s5  }
  0x1f   : > { %p26_p9 = scmp.eq.s32.totalorder %s25_s28, 0  ;;  %p35_p11 = scmp.ne.s32.totalorder %s1196_s17, %s1192_s16 }
  0x20   : > { %p36_p12 = scmp.eq.s32.totalorder %s1200_s18, 0  ;;  %p1020_p2 = scmp.lt.s32.totalorder %s1200_s18, 4 }
  0x21   : > { %s1306_s8 = scalar_select %p26_p9, %s1196_s17, %s28_s27  }
  0x22   : > { %p37_p13 = por %p36_p12, %p35_p11  ;;  %p1587_p0 = scmp.eq.s32.totalorder %s1257_s2, 3 }
  0x23   : > { %s173_s10 = sand.u32 1, %s1196_s17   ;;  %s817_s11 = sshll.u32 %s1200_s18, 9 }
  0x24   : > { %p1310_p3 = por %p1587_p0, %p35_p11  ;;  %s796_s12 = sshll.u32 %s173_s10, 5 }
  0x25   : > { %s1319_s19 = scalar_lea.hbm %s1574_s0, %s817_s11  ;;  %s177_s23 = scalar_lea.vmem [#allocation2], %s796_s12 }
  0x26   : > { %s1588_s9 = scalar_select %p1310_p3, 1, 0 }
  0x27   : > { %s184_s24 = sshll.u32 %s177_s23, 4  ;;  %p1321_p10 = pnand %p1020_p2, %p37_p13  ;;  %s1325_s24 = int_to_ptr.vmem [resolvable:$true] %s184_s24 }
  0x28   : > { %s1327_s27 = scalar_lea.sflag [#allocation3], %s173_s10  ;;  %s1104_s28 = scalar_lea.hbm %s1319_s19, 512 }
  0x29   : > { %p1105_p5 = scmp.ne.s32.totalorder %s1319_s19, %s1104_s28  ;;  %p1106_p7 = pneg %p1321_p10 }
  0x2a   : > { %s1109_s5 = scalar_lea.hbm %s1574_s0, 2048  ;;  %p1110_p12 = scmp.lt.s32.totalorder %s1319_s19, %s1574_s0 }
  0x2b   : > { %p1107_p9 = pnand %p1106_p7, %p1105_p5  ;;  %p1111_p2 = scmp.lt.s32.totalorder %s1109_s5, %s1104_s28 }
  0x2d   : > { %p1108_p11 = pneg %p1107_p9  ;;  %p1112_p13 = por %p1111_p2, %p1110_p12 }
  0x2f   : > { %p1113_p0 = pnand %p1112_p13, %p1108_p11 }
  0x31   : > { %1116 = shalt.err (!%p1113_p0)
}
  0x32   : > { %s1117_s10 = scalar_lea.vmem %s1325_s24, 512  ;;  %s1205_s11 = smov [#allocation2]  }
  0x33   : > { %p1118_p1 = scmp.ne.s32.totalorder %s1325_s24, %s1117_s10  ;;  %s1122_s12 = sshll.u32 %s1205_s11, 4  ;;  %s1123_s12 = int_to_ptr.vmem [resolvable:$false] %s1122_s12 }
  0x34   : > { %s1124_s13 = scalar_lea.vmem %s1123_s12, 1024  ;;  %p1125_p9 = scmp.lt.s32.totalorder %s1325_s24, %s1123_s12 }
  0x35   : > { %p1120_p6 = pnand %p1118_p1, %p1106_p7  ;;  %p1126_p3 = scmp.lt.s32.totalorder %s1124_s13, %s1117_s10 }
  0x37   : > { %p1121_p5 = pneg %p1120_p6  ;;  %p1127_p4 = por %p1126_p3, %p1125_p9 }
  0x39   : > { %p1128_p8 = pnand %p1127_p4, %p1121_p5 }
  0x3b   : > { %1131 = shalt.err (!%p1128_p8)
}
  0x3c   : > { %s1206_s14 = smov 128   ;;  %s1207_s23 = smov 8  }
  0x3d   : > { %1014 = dma.hbm_to_vmem [thread:$0]  (!%p1321_p10), %s1319_s19, 512, %s1325_s24, %s1327_s27, %s1206_s14, %s1206_s14, %s1207_s23  }
  0x3e   : > { %p1590_p1 = scmp.ne.s32.totalorder %s1585_s22, 0 }
  0x3f   : > { %s1351_s28 = sand.u32 (!%p1590_p1), 1, %s1192_s16   ;;  %p1591_p4 = scmp.ne.s32.totalorder (!%p1590_p1), %s1583_s20, 0 }
  0x40   : > { %196 = sbr.rel (%p1590_p1) target bundleno = 411 (0x19b), region = 36  ;;  %s800_s29 = sshll.u32 (!%p1590_p1), %s1351_s28, 5 }
  0x41   : > { %s199_s30 = scalar_lea.sflag (!%p1590_p1), [#allocation3], %s1351_s28  ;;  %s1357_s5 = scalar_lea.vmem (!%p1590_p1), [#allocation2], %s800_s29 }
  0x45   : > { %1175 = dma.done.wait (%p1591_p4), %s199_s30, 512  }
  0x46   : > { %1177 = vsyncadd (%p1591_p4), %s199_s30, 4294966784  ;;  %p1592_p6 = scmp.eq.s32.totalorder %s1257_s2, 0 }
  0x48   : > { %1179 = dma.done.wait (%p1592_p6), [#allocation6], 1024   ;;  %p1593_p8 = pmov %p1592_p6 }
  0x49   : > { %v1367_v0 = vld [vmem:[#allocation5 + $0x38] sm:$0xff]   ;;  %v1369_v1 = vld [vmem:[#allocation5 + $0x30] sm:$0xff]   ;;  %v1377_v2 = vld [vmem:[#allocation5 + $0x28] sm:$0xff]   ;;  %s230_s19 = scalar_lea.vmem [#allocation7], %s800_s29  ;;  %s818_s24 = sshll.u32 %s1257_s2, 9 }
  0x4a   : > { %1181 = vsyncadd (%p1593_p8), [#allocation6], 4294966272  ;;  %879 = vmatprep.subr.bf16.mxu0 %v1367_v0  ;;  %899 = vmatprep.subr.bf16.mxu1 %v1367_v0  ;;  %v1383_v3 = vld [vmem:[#allocation5 + $0x20] sm:$0xff]   ;;  %v1389_v5 = vld [vmem:[%s1357_s5 + $0x8] sm:$0xff]  ;;  %s709_s25 = sshll.u32 %s230_s19, 4  ;;  %s1530_s7 = scalar_lea.hbm %s1578_s4, %s818_s24  ;;  %s1532_s25 = int_to_ptr.vmem [resolvable:$true] %s709_s25 }
  0x4b   : > { %880 = vmatpush3.bf16.msra.mxu0 %v1367_v0  ;;  %900 = vmatpush3.bf16.msra.mxu1 %v1367_v0  ;;  %v1386_v4 = vld [vmem:[%s1357_s5] sm:$0xff]  ;;  %v1397_v9 = vld [vmem:[#allocation5 + $0x18] sm:$0xff]   ;;  %v1404_v13 = vld [vmem:[%s1357_s5 + $0x10] sm:$0xff]  ;;  %v476_v17 = vmul.f32 %v1389_v5, %v1389_v5  ;;  %s696_s2 = scalar_lea.sflag [#allocation4], %s1351_s28  ;;  %s1132_s10 = scalar_lea.vmem %s1532_s25, 512 }
  0x4c   : > { %881 = vmatprep.subr.bf16.mxu0 %v1369_v1  ;;  %901 = vmatprep.subr.bf16.mxu1 %v1369_v1  ;;  %v254_v6 = vpack.c.bf16 %v1389_v5, %v1386_v4  ;;  %v1407_v14 = vld [vmem:[%s1357_s5 + $0x18] sm:$0xff]  ;;  %v1411_v15 = vld [vmem:[#allocation5 + $0x10] sm:$0xff]   ;;  %v475_v16 = vmul.f32 %v1386_v4, %v1386_v4  ;;  %v1423_v19 = vld [vmem:[#allocation5 + $0x8] sm:$0xff]   ;;  %v477_v37 = vmul.f32 %v1404_v13, %v1404_v13  ;;  %p1133_p3 = scmp.ne.s32.totalorder %s1532_s25, %s1132_s10  ;;  %p1594_p10 = scmp.ne.s32.totalorder %s1588_s9, 0 }
  0x4d   : > { %v255_v18 = vpack.c.bf16 %v1407_v14, %v1404_v13  ;;  %v1431_v23 = vld [vmem:[#allocation5] sm:$0xff]   ;;  %v478_v38 = vmul.f32 %v1407_v14, %v1407_v14  ;;  %s1208_s11 = smov [#allocation7]  }
  0x4e   : > { %v256_v7 = vunpack.c.l.bf16 %v254_v6  ;;  %v257_v8 = vunpack.c.h.bf16 %v254_v6  ;;  %915 = vmatprep.mubr.bf16.mxu1 %v254_v6  ;;  %v1425_v20 = vpack.c.bf16 %v476_v17, %v475_v16  ;;  %p1134_p7 = pnand %p1133_p3, %p1594_p10  ;;  %s1136_s12 = sshll.u32 %s1208_s11, 4  ;;  %s1137_s12 = int_to_ptr.vmem [resolvable:$false] %s1136_s12 }
  0x4f   : > { %882 = vmatpush3.bf16.msra.mxu0 %v1369_v1  ;;  %902 = vmatpush3.bf16.msra.mxu1 %v1369_v1  ;;  %v258_v21 = vunpack.c.l.bf16 %v255_v18  ;;  %v259_v22 = vunpack.c.h.bf16 %v255_v18  ;;  %v1465_v39 = vpack.c.bf16 %v478_v38, %v477_v37  ;;  %s1138_s13 = scalar_lea.vmem %s1137_s12, 1024  ;;  %p1139_p12 = scmp.lt.s32.totalorder %s1532_s25, %s1137_s12 }
  0x50   : > { %883 = vmatprep.subr.bf16.mxu0 %v1377_v2  ;;  %903 = vmatprep.subr.bf16.mxu1 %v1377_v2  ;;  %v260_v10 = vsub.f32 %v1386_v4, %v256_v7  ;;  %v261_v11 = vsub.f32 %v1389_v5, %v257_v8  ;;  %v481_v26 = vunpack.c.l.bf16 %v1425_v20  ;;  %v482_v27 = vunpack.c.h.bf16 %v1425_v20  ;;  %p1135_p11 = pneg %p1134_p7  ;;  %p1140_p2 = scmp.lt.s32.totalorder %s1138_s13, %s1132_s10 }
  0x51   : > { %v262_v28 = vsub.f32 %v1404_v13, %v258_v21  ;;  %v263_v29 = vsub.f32 %v1407_v14, %v259_v22  ;;  %v483_v42 = vunpack.c.l.bf16 %v1465_v39  ;;  %v484_v43 = vunpack.c.h.bf16 %v1465_v39 }
  0x52   : > { %v264_v12 = vpack.c.bf16 %v261_v11, %v260_v10  ;;  %v485_v32 = vsub.f32 %v475_v16, %v481_v26  ;;  %v486_v33 = vsub.f32 %v476_v17, %v482_v27  ;;  %p1141_p13 = por %p1140_p2, %p1139_p12 }
  0x53   : > { %884 = vmatpush3.bf16.msra.mxu0 %v1377_v2  ;;  %904 = vmatpush3.bf16.msra.mxu1 %v1377_v2  ;;  %v265_v34 = vpack.c.bf16 %v263_v29, %v262_v28  ;;  %v487_v48 = vsub.f32 %v477_v37, %v483_v42  ;;  %v488_v49 = vsub.f32 %v478_v38, %v484_v43 }
  0x54   : > { %885 = vmatprep.subr.bf16.mxu0 %v1383_v3  ;;  %905 = vmatprep.subr.bf16.mxu1 %v1383_v3  ;;  %v266_v24 = vunpack.c.l.bf16 %v264_v12  ;;  %v267_v25 = vunpack.c.h.bf16 %v264_v12  ;;  %v489_v36 = vpack.c.bf16 %v486_v33, %v485_v32  ;;  %p1142_p0 = pnand %p1141_p13, %p1135_p11 }
  0x55   : > { %895 = vmatprep.mubr.bf16.mxu0 %v264_v12  ;;  %v268_v40 = vunpack.c.l.bf16 %v265_v34  ;;  %v269_v41 = vunpack.c.h.bf16 %v265_v34  ;;  %v490_v53 = vpack.c.bf16 %v488_v49, %v487_v48 }
  0x56   : > { %v270_v30 = vsub.f32 %v260_v10, %v266_v24  ;;  %v271_v31 = vsub.f32 %v261_v11, %v267_v25  ;;  %v491_v44 = vunpack.c.l.bf16 %v489_v36  ;;  %v492_v45 = vunpack.c.h.bf16 %v489_v36 }
  0x57   : > { %886 = vmatpush3.bf16.msra.mxu0 %v1383_v3  ;;  %906 = vmatpush3.bf16.msra.mxu1 %v1383_v3  ;;  %v272_v46 = vsub.f32 %v262_v28, %v268_v40  ;;  %v273_v47 = vsub.f32 %v263_v29, %v269_v41  ;;  %v493_v55 = vunpack.c.l.bf16 %v490_v53  ;;  %v494_v56 = vunpack.c.h.bf16 %v490_v53 }
  0x58   : > { %887 = vmatprep.subr.bf16.mxu0 %v1397_v9  ;;  %907 = vmatprep.subr.bf16.mxu1 %v1397_v9  ;;  %v420_v35 = vpack.c.bf16 %v271_v31, %v270_v30  ;;  %v495_v50 = vsub.f32 %v485_v32, %v491_v44  ;;  %v496_v51 = vsub.f32 %v486_v33, %v492_v45 }
  0x59   : > { %v421_v52 = vpack.c.bf16 %v273_v47, %v272_v46  ;;  %v497_v57 = vsub.f32 %v487_v48, %v493_v55  ;;  %v498_v58 = vsub.f32 %v488_v49, %v494_v56 }
  0x5a   : > { %v597_v54 = vpack.c.bf16 %v496_v51, %v495_v50 }
  0x5b   : > { %888 = vmatpush3.bf16.msra.mxu0 %v1397_v9  ;;  %908 = vmatpush3.bf16.msra.mxu1 %v1397_v9  ;;  %v598_v59 = vpack.c.bf16 %v498_v58, %v497_v57 }
  0x5c   : > { %889 = vmatprep.subr.bf16.mxu0 %v1411_v15  ;;  %909 = vmatprep.subr.bf16.mxu1 %v1411_v15 }
  0x5f   : > { %890 = vmatpush3.bf16.msra.mxu0 %v1411_v15  ;;  %910 = vmatpush3.bf16.msra.mxu1 %v1411_v15 }
  0x60   : > { %891 = vmatprep.subr.bf16.mxu0 %v1423_v19  ;;  %911 = vmatprep.subr.bf16.mxu1 %v1423_v19 }
  0x63   : > { %892 = vmatpush3.bf16.msra.mxu0 %v1423_v19  ;;  %912 = vmatpush3.bf16.msra.mxu1 %v1423_v19 }
  0x64   : > { %893 = vmatprep.subr.bf16.mxu0 %v1431_v23  ;;  %913 = vmatprep.subr.bf16.mxu1 %v1431_v23 }
  0x67   : > { %894 = vmatpush3.bf16.msra.mxu0 %v1431_v23  ;;  %914 = vmatpush3.bf16.msra.mxu1 %v1431_v23 }
  0x68   : > { %919 = vmatprep.subr.bf16.mxu0 %v1367_v0  ;;  %939 = vmatprep.subr.bf16.mxu1 %v1367_v0 }
  0x6a   : > { %896 = vmatmul.mubr.bf16.vlgmr.msra.gmra.mxu0 %v265_v34  ;;  %916 = vmatmul.mubr.bf16.vlgmr.msra.gmra.mxu1 %v255_v18 }
  0x6b   : > { %920 = vmatpush3.bf16.msra.mxu0 %v1367_v0  ;;  %940 = vmatpush3.bf16.msra.mxu1 %v1367_v0 }
  0x6c   : > { %921 = vmatprep.subr.bf16.mxu0 %v1369_v1  ;;  %941 = vmatprep.subr.bf16.mxu1 %v1369_v1 }
  0x6d   : > { %935 = vmatprep.mubr.bf16.mxu0 %v420_v35  ;;  %955 = vmatprep.mubr.bf16.mxu1 %v489_v36 }
  0x6f   : > { %922 = vmatpush3.bf16.msra.mxu0 %v1369_v1  ;;  %942 = vmatpush3.bf16.msra.mxu1 %v1369_v1 }
  0x70   : > { %923 = vmatprep.subr.bf16.mxu0 %v1377_v2  ;;  %943 = vmatprep.subr.bf16.mxu1 %v1377_v2 }
  0x73   : > { %924 = vmatpush3.bf16.msra.mxu0 %v1377_v2  ;;  %944 = vmatpush3.bf16.msra.mxu1 %v1377_v2 }
  0x74   : > { %925 = vmatprep.subr.bf16.mxu0 %v1383_v3  ;;  %945 = vmatprep.subr.bf16.mxu1 %v1383_v3 }
  0x77   : > { %926 = vmatpush3.bf16.msra.mxu0 %v1383_v3  ;;  %946 = vmatpush3.bf16.msra.mxu1 %v1383_v3 }
  0x78   : > { %927 = vmatprep.subr.bf16.mxu0 %v1397_v9  ;;  %947 = vmatprep.subr.bf16.mxu1 %v1397_v9 }
  0x7b   : > { %928 = vmatpush3.bf16.msra.mxu0 %v1397_v9  ;;  %948 = vmatpush3.bf16.msra.mxu1 %v1397_v9 }
  0x7c   : > { %929 = vmatprep.subr.bf16.mxu0 %v1411_v15  ;;  %949 = vmatprep.subr.bf16.mxu1 %v1411_v15 }
  0x7f   : > { %930 = vmatpush3.bf16.msra.mxu0 %v1411_v15  ;;  %950 = vmatpush3.bf16.msra.mxu1 %v1411_v15 }
  0x80   : > { %931 = vmatprep.subr.bf16.mxu0 %v1423_v19  ;;  %951 = vmatprep.subr.bf16.mxu1 %v1423_v19 }
  0x83   : > { %932 = vmatpush3.bf16.msra.mxu0 %v1423_v19  ;;  %952 = vmatpush3.bf16.msra.mxu1 %v1423_v19 }
  0x84   : > { %933 = vmatprep.subr.bf16.mxu0 %v1431_v23  ;;  %953 = vmatprep.subr.bf16.mxu1 %v1431_v23 }
  0x87   : > { %934 = vmatpush3.bf16.msra.mxu0 %v1431_v23  ;;  %954 = vmatpush3.bf16.msra.mxu1 %v1431_v23 }
  0x88   : > { %959 = vmatprep.subr.bf16.mxu0 %v1367_v0  ;;  %979 = vmatprep.subr.bf16.mxu1 %v1367_v0 }
  0x8a   : > { %936 = vmatmul.mubr.bf16.vlgmr.msra.gmra.mxu0 %v421_v52  ;;  %956 = vmatmul.mubr.bf16.vlgmr.msra.gmra.mxu1 %v490_v53 }
  0x8b   : > { %960 = vmatpush3.bf16.msra.mxu0 %v1367_v0  ;;  %980 = vmatpush3.bf16.msra.mxu1 %v1367_v0 }
  0x8c   : > { %961 = vmatprep.subr.bf16.mxu0 %v1369_v1  ;;  %981 = vmatprep.subr.bf16.mxu1 %v1369_v1 }
  0x8d   : > { %975 = vmatprep.mubr.bf16.mxu0 %v1425_v20  ;;  %995 = vmatprep.mubr.bf16.mxu1 %v597_v54 }
  0x8f   : > { %962 = vmatpush3.bf16.msra.mxu0 %v1369_v1  ;;  %982 = vmatpush3.bf16.msra.mxu1 %v1369_v1 }
  0x90   : > { %963 = vmatprep.subr.bf16.mxu0 %v1377_v2  ;;  %983 = vmatprep.subr.bf16.mxu1 %v1377_v2 }
  0x93   : > { %964 = vmatpush3.bf16.msra.mxu0 %v1377_v2  ;;  %984 = vmatpush3.bf16.msra.mxu1 %v1377_v2 }
  0x94   : > { %965 = vmatprep.subr.bf16.mxu0 %v1383_v3  ;;  %985 = vmatprep.subr.bf16.mxu1 %v1383_v3 }
  0x97   : > { %966 = vmatpush3.bf16.msra.mxu0 %v1383_v3  ;;  %986 = vmatpush3.bf16.msra.mxu1 %v1383_v3 }
  0x98   : > { %967 = vmatprep.subr.bf16.mxu0 %v1397_v9  ;;  %987 = vmatprep.subr.bf16.mxu1 %v1397_v9 }
  0x9b   : > { %968 = vmatpush3.bf16.msra.mxu0 %v1397_v9  ;;  %988 = vmatpush3.bf16.msra.mxu1 %v1397_v9 }
  0x9c   : > { %969 = vmatprep.subr.bf16.mxu0 %v1411_v15  ;;  %989 = vmatprep.subr.bf16.mxu1 %v1411_v15 }
  0x9f   : > { %970 = vmatpush3.bf16.msra.mxu0 %v1411_v15  ;;  %990 = vmatpush3.bf16.msra.mxu1 %v1411_v15 }
  0xa0   : > { %971 = vmatprep.subr.bf16.mxu0 %v1423_v19  ;;  %991 = vmatprep.subr.bf16.mxu1 %v1423_v19 }
  0xa3   : > { %972 = vmatpush3.bf16.msra.mxu0 %v1423_v19  ;;  %992 = vmatpush3.bf16.msra.mxu1 %v1423_v19 }
  0xa4   : > { %973 = vmatprep.subr.bf16.mxu0 %v1431_v23  ;;  %993 = vmatprep.subr.bf16.mxu1 %v1431_v23 }
  0xa7   : > { %974 = vmatpush3.bf16.msra.mxu0 %v1431_v23  ;;  %994 = vmatpush3.bf16.msra.mxu1 %v1431_v23 }
  0xaa   : > { %976 = vmatmul.mubr.bf16.vlgmr.msra.gmra.mxu0 %v1465_v39  ;;  %996 = vmatmul.mubr.bf16.vlgmr.msra.gmra.mxu1 %v598_v59 }
 0x12a   : > { %v897_v60 = vpop.f32.mrf.mxu0  ;;  %v917_v61 = vpop.f32.mrf.mxu1 }
 0x12b   : > { %v414_v12 = vadd.f32 %v917_v61, %v897_v60  ;;  %v811_v61 = vld [vmem:[%s1575_s1] ss:$0 sm:$0xff] }
 0x12c   : > { %v356_v62 = vpop.f32.mrf.mxu0  ;;  %v405_v63 = vpop.f32.mrf.mxu1 }
 0x12d   : > { %v406_v15 = vadd.f32 %v405_v63, %v356_v62 }
 0x12e   : > { %v898_v0 = vpop.f32.mrf.mxu0  ;;  %v918_v1 = vpop.f32.mrf.mxu1 }
 0x12f   : > { %v417_v17 = vadd.f32 %v918_v1, %v898_v0 }
 0x130   : > { %v359_v2 = vpop.f32.mrf.mxu0  ;;  %v408_v3 = vpop.f32.mrf.mxu1 }
 0x131   : > { %v409_v21 = vadd.f32 %v408_v3, %v359_v2 }
 0x14a   : > { %v937_v6 = vpop.f32.mrf.mxu0  ;;  %v957_v7 = vpop.f32.mrf.mxu1 }
 0x14b   : > { %v473_v16 = vadd.f32 %v937_v6, %v414_v12 }
 0x14c   : > { %v456_v8 = vpop.f32.mrf.mxu0  ;;  %v533_v9 = vpop.f32.mrf.mxu1 }
 0x14d   : > { %v471_v18 = vadd.f32 %v456_v8, %v406_v15  ;;  %v654_v25 = vmul.f32 0.03125, %v473_v16 }
 0x14e   : > { %v938_v10 = vpop.f32.mrf.mxu0  ;;  %v958_v11 = vpop.f32.mrf.mxu1 }
 0x14f   : > { %v474_v22 = vadd.f32 %v938_v10, %v417_v17  ;;  %v652_v27 = vmul.f32 0.03125, %v471_v18  ;;  %v662_v36 = vmul.f32 %v654_v25, %v654_v25 }
 0x150   : > { %v459_v19 = vpop.f32.mrf.mxu0  ;;  %v536_v20 = vpop.f32.mrf.mxu1 }
 0x151   : > { %v472_v28 = vadd.f32 %v459_v19, %v409_v21  ;;  %v655_v33 = vmul.f32 0.03125, %v474_v22  ;;  %v660_v40 = vmul.f32 %v652_v27, %v652_v27 }
 0x153   : > { %v653_v41 = vmul.f32 0.03125, %v472_v28  ;;  %v663_v47 = vmul.f32 %v655_v33, %v655_v33 }
 0x155   : > { %v661_v53 = vmul.f32 %v653_v41, %v653_v41 }
 0x16a   : > { %v977_v23 = vpop.f32.mrf.mxu0  ;;  %v997_v24 = vpop.f32.mrf.mxu1 }
 0x16b   : > { %v591_v26 = vadd.f32 %v977_v23, %v957_v7 }
 0x16c   : > { %v582_v29 = vpop.f32.mrf.mxu0  ;;  %v633_v30 = vpop.f32.mrf.mxu1 }
 0x16d   : > { %v650_v31 = vadd.f32 %v997_v24, %v591_v26  ;;  %v583_v32 = vadd.f32 %v582_v29, %v533_v9 }
 0x16e   : > { %v978_v34 = vpop.f32.mrf.mxu0  ;;  %v998_v35 = vpop.f32.mrf.mxu1 }
 0x16f   : > { %v658_v37 = vmul.f32 0.03125, %v650_v31  ;;  %v648_v38 = vadd.f32 %v633_v30, %v583_v32  ;;  %v594_v39 = vadd.f32 %v978_v34, %v958_v11 }
 0x170   : > { %v585_v42 = vpop.f32.mrf.mxu0  ;;  %v636_v48 = vpop.f32.mrf.mxu1 }
 0x171   : > { %v666_v43 = vsub.f32 %v658_v37, %v662_v36  ;;  %v656_v44 = vmul.f32 0.03125, %v648_v38  ;;  %v651_v45 = vadd.f32 %v998_v35, %v594_v39  ;;  %v586_v46 = vadd.f32 %v585_v42, %v536_v20 }
 0x173   : > { %v670_v49 = vadd.f32 1e-05, %v666_v43  ;;  %v664_v50 = vsub.f32 %v656_v44, %v660_v40  ;;  %v659_v51 = vmul.f32 0.03125, %v651_v45  ;;  %v649_v52 = vadd.f32 %v636_v48, %v586_v46 }
 0x175   : > { %1070 = vrsqrt.f32 %v670_v49  ;;  %v668_v54 = vadd.f32 1e-05, %v664_v50  ;;  %v667_v55 = vsub.f32 %v659_v51, %v663_v47  ;;  %v657_v56 = vmul.f32 0.03125, %v649_v52 }
 0x177   : > { %1072 = vrsqrt.f32 %v668_v54  ;;  %v671_v57 = vadd.f32 1e-05, %v667_v55  ;;  %v665_v58 = vsub.f32 %v657_v56, %v661_v53 }
 0x179   : > { %1074 = vrsqrt.f32 %v671_v57  ;;  %v669_v59 = vadd.f32 1e-05, %v665_v58 }
 0x17b   : > { %1076 = vrsqrt.f32 %v669_v59 }
 0x182   : > { %v1071_v60 = vpop.eup %1070 }
 0x183   : > { %v679_v62 = vmul.f32 %v1071_v60, %v1404_v13 }
 0x184   : > { %v1073_v63 = vpop.eup %1072 }
 0x185   : > { %v689_v0 = vmul.f32 %v811_v61, %v679_v62  ;;  %v677_v1 = vmul.f32 %v1073_v63, %v1386_v4 }
 0x186   : > { %v1075_v2 = vpop.eup %1074 }
 0x187   : > { %v687_v3 = vmul.f32 %v811_v61, %v677_v1  ;;  %v680_v6 = vmul.f32 %v1075_v2, %v1407_v14  ;;  %693 = vst [vmem:[%s230_s19 + $0x10] sm:$0xff] %v689_v0 }
 0x188   : > { %v1077_v7 = vpop.eup %1076 }
 0x189   : > { %v690_v8 = vmul.f32 %v811_v61, %v680_v6  ;;  %v678_v9 = vmul.f32 %v1077_v7, %v1389_v5  ;;  %691 = vst [vmem:[%s230_s19] sm:$0xff] %v687_v3 }
 0x18b   : > { %v688_v4 = vmul.f32 %v811_v61, %v678_v9  ;;  %694 = vst [vmem:[%s230_s19 + $0x18] sm:$0xff] %v690_v8 }
 0x18d   : > { %692 = vst [vmem:[%s230_s19 + $0x8] sm:$0xff] %v688_v4 }
 0x18e   : > { %1145 = shalt.err (!%p1142_p0)
}
 0x18f   : > { %s1146_s14 = scalar_lea.hbm %s1530_s7, 512  ;;  %s1150_s30 = scalar_lea.hbm %s1578_s4, 2048 }
 0x190   : > { %p1147_p5 = scmp.ne.s32.totalorder %s1530_s7, %s1146_s14  ;;  %p1151_p4 = scmp.lt.s32.totalorder %s1530_s7, %s1578_s4 }
 0x191   : > { %p1152_p6 = scmp.lt.s32.totalorder %s1150_s30, %s1146_s14 }
 0x192   : > { %p1148_p9 = pnand %p1147_p5, %p1594_p10 }
 0x193   : > { %p1153_p8 = por %p1152_p6, %p1151_p4 }
 0x194   : > { %p1149_p1 = pneg %p1148_p9 }
 0x196   : > { %p1154_p3 = pnand %p1153_p8, %p1149_p1 }
 0x198   : > { %1157 = shalt.err (!%p1154_p3)
}
 0x199   : > { %s1209_s22 = smov 128   ;;  %s1210_s19 = smov 8  }
 0x19a   : > { %1005 = dma.vmem_to_hbm [thread:$0]  (%p1594_p10), %s1532_s25, 512, %s1530_s7, %s696_s2, %s1209_s22, %s1209_s22, %s1210_s19  }
 0x19b PF: > { %p1022_p7 = scmp.ge.s32.totalorder %s1200_s18, 2  ;;  %s724_s24 = sand.u32 1, %s1188_s15  }
 0x19c   : > { %p1595_p11 = scmp.ne.s32.totalorder %s1584_s21, 0  ;;  %s725_s27 = scalar_lea.sflag [#allocation4], %s724_s24 }
 0x19e   : > { %p1016_p12 = pnand %p1022_p7, %p1595_p11 }
 0x1a0   : > { %p1017_p2 = pneg %p1016_p12 }
 0x1a2   : > { %1183 = dma.done.wait (%p1017_p2), %s725_s27, 512  }
 0x1a3   : > { %1185 = vsyncadd (%p1017_p2), %s725_s27, 4294966784  ;;  %p18_p13 = scmp.ge.s32.totalorder %s1289_s26, 6   ;;  %s1596_s15 = smov %s1192_s16 }
 0x1a4   : > { %s1597_s16 = smov %s1196_s17  ;;  %s1598_s17 = smov %s1306_s8 }
 0x1a5   : > { %s1599_s18 = smov %s1289_s26  ;;  %20 = sbr.rel (!%p18_p13) target bundleno = 6 (0x6), region = 85 }
 0x1aa   :  { %730 = vsyncpa [#allocation3], 1 }
 0x1ab   :  { %732 = vsyncpa [#allocation3 + $0x1], 1 }
 0x1ac   :  { %733 = vsyncpa [#allocation6], 1 }
 0x1ad   :  { %734 = vsyncpa [#allocation4], 1 }
 0x1ae   :  { %736 = vsyncpa [#allocation4 + $0x1], 1 }

</bundles_post_ra>
